<compile_context>
chip_gen: v6e
topology: v6e:2x2x1
jax: 0.10.0
libtpu: 0.0.40
codegen_flags: <defaults>
</compile_context>

<pallas_src>
import functools

import jax
import jax.numpy as jnp
from jax.experimental import pallas as pl
from jax.experimental.pallas import tpu as pltpu


_LANE_CANDIDATES = (8192, 4096, 2048, 1024, 512, 256, 128)


@functools.lru_cache(maxsize=None)
def _tpu_budgets():
    """(tile_target_bytes, vmem_limit_bytes) tuned per TPU generation."""
    try:
        info = pltpu.get_tpu_info()
        vmem_cap = int(getattr(info, "vmem_capacity_bytes", 128 * 1024 * 1024))
    except Exception:
        vmem_cap = 128 * 1024 * 1024
    if vmem_cap <= 96 * 1024 * 1024:
        # v7x-class: 64 MiB VMEM/TC but ~3.2 TB/s HBM -> larger blocks to
        # amortize the ~0.35us per-grid-step overhead.  Pipeline buffers:
        # (in + out) x 2 bufs x 8 MiB = 32 MiB; give the compiler 44 MiB.
        return 8 * 1024 * 1024, 44 * 1024 * 1024
    # v5e / v6e: f32 streaming plateaus around 2-4 MiB blocks.  Buffers:
    # 2 x 2 x 4 MiB = 16 MiB; explicit 32 MiB limit (v5e scoped default is
    # only 16 MiB, so the override matters there).
    return 4 * 1024 * 1024, 32 * 1024 * 1024


def _input_norm_kernel(x_ref, o_ref, *, neg_mean, inv_std):
    # Single VPU add+mul; constants baked at trace time (no SMEM traffic,
    # no per-tile divide).  Math in f32 -- free, the kernel is memory-bound.
    x = x_ref[...].astype(jnp.float32)
    o_ref[...] = ((x + neg_mean) * inv_std).astype(o_ref.dtype)


def _choose_lanes(n):
    """Largest lane-dense width (multiple of 128) that evenly divides n."""
    for lanes in _LANE_CANDIDATES:
        if n % lanes == 0:
            return lanes
    return 128  # unreachable: n is always a multiple of 128 here


def _choose_tile_rows(rows, lanes, itemsize, target_bytes):
    """Row tile near target_bytes, dtype-aware sublane-aligned, preferring an
    exact divisor of `rows` so the last block is never clipped/masked."""
    sub = max(8, 32 // itemsize)          # 8 for f32, 16 for bf16, 32 for int8/fp8
    target_elems = max(1, target_bytes // itemsize)
    tile_r = (target_elems // lanes // sub) * sub
    if tile_r <= 0 or tile_r >= rows:
        return rows                        # small input: one full-dim block
    for cand in range(tile_r, sub - 1, -sub):
        if rows % cand == 0:
            return cand                    # exact divisor -> unmasked vst everywhere
    return tile_r                          # fall back; pl.cdiv clips last block


def _input_norm_impl(x, mean, std):
    orig_shape = x.shape
    total = x.size
    dtype = x.dtype
    itemsize = jnp.dtype(dtype).itemsize

    # Construction-time scalar math in full python-float precision.
    neg_mean = -float(mean)
    inv_std = 1.0 / float(std)

    flat = x.reshape(-1)

    # Pallas handles the 128-aligned prefix; the <=127-element tail (if any)
    # is normalized with plain jnp.  No full-array pad/slice passes.
    tail = total % 128
    main = total - tail

    outs = []
    if main:
        lanes = _choose_lanes(main)
        rows = main // lanes
        tile_bytes, vmem_limit = _tpu_budgets()
        tile_r = _choose_tile_rows(rows, lanes, itemsize, tile_bytes)
        grid = (pl.cdiv(rows, tile_r),)

        kernel = functools.partial(
            _input_norm_kernel, neg_mean=neg_mean, inv_std=inv_std
        )
        src = flat if tail == 0 else flat[:main]
        main_out = pl.pallas_call(
            kernel,
            out_shape=jax.ShapeDtypeStruct((rows, lanes), dtype),
            grid=grid,
            in_specs=[
                # NOTE: on v7x optionally sweep pipeline_mode=pl.Buffered(3);
                # default double-buffering already keeps this near HBM roofline.
                pl.BlockSpec((tile_r, lanes), lambda i: (i, 0)),
            ],
            out_specs=pl.BlockSpec((tile_r, lanes), lambda i: (i, 0)),
            compiler_params=pltpu.CompilerParams(
                # "parallel" lets v7x shard the row axis across its 2 TCs;
                # no-op on single-TC v5e/v6e.
                dimension_semantics=("parallel",),
                vmem_limit_bytes=vmem_limit,
            ),
        )(src.reshape(rows, lanes))
        outs.append(main_out.reshape(-1))

    if tail:
        t = flat[main:].astype(jnp.float32)
        outs.append(((t + neg_mean) * inv_std).astype(dtype))

    out = outs[0] if len(outs) == 1 else jnp.concatenate(outs)
    return out.reshape(orig_shape)


# mean/std are nn.Module construction scalars -> static args; jit fuses away
# the reshape glue.  Call sites that can give up `x` may additionally pass
# donate_argnums=(0,) so the output aliases x's HBM buffer.
input_norm = jax.jit(_input_norm_impl, static_argnums=(1, 2))


if __name__ == "__main__":
    # Deterministic "parameters" (module __init__ args) and input.
    MEAN = 0.5
    STD = 0.25

    key = jax.random.PRNGKey(0)
    x = jax.random.normal(key, (2, 4, 16, 16), dtype=jnp.float32)  # NCHW

    out = jax.block_until_ready(input_norm(x, MEAN, STD))

    # Reference check against the plain-JAX semantics of the PyTorch forward.
    ref = (x + (-MEAN)) * (1.0 / STD)
    assert out.shape == x.shape and out.dtype == x.dtype
    assert jnp.allclose(out, ref, atol=1e-6, rtol=1e-6)

    print("KERNEL_OK")
</pallas_src>

<mosaic_0001>
module attributes {stable_mosaic.version = 11 : i64} {
  func.func @_input_norm_kernel(%arg0: i32, %arg1: memref<1x2048xf32, #tpu.memory_space<vmem>>, %arg2: memref<1x2048xf32, #tpu.memory_space<vmem>>) attributes {dimension_semantics = [#tpu.dimension_semantics<parallel>], iteration_bounds = array<i64: 1>, scalar_prefetch = 0 : i64, scratch_operands = 0 : i64, tpu.core_type = #tpu.core_type<tc>, window_params = [{transform_indices = @transform_0, window_bounds = array<i64: 1, 2048>}, {transform_indices = @transform_1, window_bounds = array<i64: 1, 2048>}]} {
    %c0 = arith.constant 0 : index
    %c0_0 = arith.constant 0 : index
    %0 = vector.load %arg1[%c0, %c0_0] : memref<1x2048xf32, #tpu.memory_space<vmem>>, vector<1x2048xf32>
    %cst = arith.constant -5.000000e-01 : f32
    %1 = vector.broadcast %cst : f32 to vector<1x2048xf32>
    %2 = arith.addf %0, %1 : vector<1x2048xf32>
    %cst_1 = arith.constant 4.000000e+00 : f32
    %3 = vector.broadcast %cst_1 : f32 to vector<1x2048xf32>
    %4 = arith.mulf %2, %3 : vector<1x2048xf32>
    %c0_2 = arith.constant 0 : index
    %c0_3 = arith.constant 0 : index
    %5 = vector.load %arg2[%c0_2, %c0_3] : memref<1x2048xf32, #tpu.memory_space<vmem>>, vector<1x2048xf32>
    tpu.vector_store %arg2[%c0_2, %c0_3], %4 {strides = array<i32>} : memref<1x2048xf32, #tpu.memory_space<vmem>>, vector<1x2048xf32>,
    return
  }
  func.func @transform_0(%arg0: i32) -> (i32, i32) {
    %c0_i32 = arith.constant 0 : i32
    %c0_i32_0 = arith.constant 0 : i32
    return %arg0, %c0_i32 : i32, i32
  }
  func.func @transform_1(%arg0: i32) -> (i32, i32) {
    %c0_i32 = arith.constant 0 : i32
    %c0_i32_0 = arith.constant 0 : i32
    return %arg0, %c0_i32 : i32, i32
  }
}

</mosaic_0001>

<bundles_post_ra>
// kernel: _input_norm_impl.1
= control target key start
LH: loop header
LB: loop body
LE: loop exit
PB: predicated region body
PF: predicated region fallthrough
CT: control target
= control target key end

     0   :  { %s42_s0 = inlined_call_operand.vmem [shape: f32[1,2048], index: 0, kind: input, shape index: {}]   ;;  %s43_s1 = inlined_call_operand.vmem [shape: f32[1,2048], index: 1, kind: output, shape index: {}]  }
   0x1   :  { %v8_v0 = vld [vmem:[%s42_s0] sm:$0xff]  ;;  %v9_v1 = vld [vmem:[%s42_s0 + $0x8] sm:$0xff] }
   0x2   :  { %v10_v2 = vadd.f32 -0.5, %v8_v0  ;;  %v11_v3 = vadd.f32 -0.5, %v9_v1 }
   0x4   :  { %v12_v4 = vmul.f32 4.0, %v10_v2  ;;  %v13_v5 = vmul.f32 4.0, %v11_v3 }
   0x6   :  { %14 = vst [vmem:[%s43_s1] sm:$0xff] %v12_v4  ;;  %15 = vst [vmem:[%s43_s1 + $0x8] sm:$0xff] %v13_v5 }

</bundles_post_ra>
